<compile_context>
chip_gen: v7x
topology: tpu7x:2x2x1
jax: 0.10.0
libtpu: 0.0.40
codegen_flags: <defaults>
</compile_context>

<pallas_src>
import jax
import jax.numpy as jnp
from jax.experimental import pallas as pl
from jax.experimental.pallas import tpu as pltpu

# Embedding table sizes, mirroring the PyTorch __init__.
VOCABS = (26, 11, 18, 32, 7)
DIMS = (5, 3, 3, 3, 5)
OUT_DIM = sum(DIMS)                       # 19
OFFSETS = (0, 26, 37, 55, 87)             # cumulative row offsets of each table
TOTAL_ROWS = 94                           # sum(VOCABS)
FUSED_ROWS = 128                          # padded to the MXU K width


def _season_embed_kernel(x_ref, table_ref, o_ref):
    # x_ref:     (TN, 5) int32; per-column table offsets ALREADY added by the
    #            wrapper, so column k's values live in [OFFSETS[k], OFFSETS[k]+VOCABS[k]).
    # table_ref: (128, 19) float32 block-diagonal fused table (rows >= 94 are zero).
    x = x_ref[...]

    # (1, 128) lane iota; the range compares against Python constants below are
    # tiny / fold at compile time.
    lane = jax.lax.broadcasted_iota(jnp.int32, (1, FUSED_ROWS), 1)

    # Pick the owning column per lane (4 selects), then one compare + one cast
    # builds the whole (TN, 128) multi-hot.  Lanes >= 94 select column 4 whose
    # offset codes are < 94, so they can never match and stay zero.
    sel = jnp.where(lane >= OFFSETS[1], x[:, 1:2], x[:, 0:1])
    sel = jnp.where(lane >= OFFSETS[2], x[:, 2:3], sel)
    sel = jnp.where(lane >= OFFSETS[3], x[:, 3:4], sel)
    sel = jnp.where(lane >= OFFSETS[4], x[:, 4:5], sel)
    multihot = (sel == lane).astype(table_ref.dtype)

    # One fused gather-as-matmul on the MXU: (TN,128) @ (128,19) -> (TN,19).
    o_ref[...] = jnp.dot(
        multihot, table_ref[...], preferred_element_type=jnp.float32
    ).astype(o_ref.dtype)


def _build_fused_table(tables):
    """Pack the 5 embedding tables block-diagonally into one (128, 19) table."""
    fused = jnp.zeros((FUSED_ROWS, OUT_DIM), dtype=jnp.float32)
    row = 0
    col = 0
    for t, d in zip(tables, DIMS):
        v = t.shape[0]
        fused = fused.at[row:row + v, col:col + d].set(t.astype(jnp.float32))
        row += v
        col += d
    return fused


def season_embedding(x, tables, *, tile_n=4096):
    """x: int array [..., 5]; tables: tuple of 5 float32 tables. Returns [..., 19]."""
    assert x.shape[-1] == 5
    lead_shape = x.shape[:-1]
    n = 1
    for d in lead_shape:
        n *= d

    # Flatten and pre-add per-column table offsets: moves 5 adds out of the
    # kernel and makes each column's code range disjoint.
    x_flat = x.reshape(n, 5).astype(jnp.int32) + jnp.asarray(OFFSETS, jnp.int32)

    fused_table = _build_fused_table(tables)

    # Tile size: large (amortizes the ~0.35 us per-grid-step overhead), a
    # multiple of 8 (sublane), and never larger than needed.
    n_ceil8 = pl.cdiv(n, 8) * 8
    tn = max(8, (min(tile_n, n_ceil8) // 8) * 8)
    # Megacore: keep >= 2 steps on the single "parallel" axis when there is
    # enough work (v7x has 2 TensorCores; a grid of 1 would idle one of them).
    if n_ceil8 >= 16 and pl.cdiv(n_ceil8, tn) < 2:
        tn = max(8, pl.cdiv(pl.cdiv(n_ceil8, 2), 8) * 8)

    n_pad = pl.cdiv(n, tn) * tn
    if n_pad != n:
        # Zero pad rows are harmless lookups and are sliced off before return.
        x_flat = jnp.pad(x_flat, ((0, n_pad - n), (0, 0)))

    # VMEM budget: (tn,5)/(tn,19) blocks are lane-padded to 128 and
    # double-buffered, plus ~(tn,128) sel/multihot temporaries -> ~16 MiB at
    # tn=4096.  Request headroom, capped at 48 MiB (< v7x's 64 MiB physical).
    est = 8 * tn * 128 * 4 + 2 * FUSED_ROWS * 128 * 4
    vmem_limit = int(min(max(est + (2 << 20), 32 << 20), 48 << 20))

    out = pl.pallas_call(
        _season_embed_kernel,
        out_shape=jax.ShapeDtypeStruct((n_pad, OUT_DIM), jnp.float32),
        grid_spec=pltpu.PrefetchScalarGridSpec(
            num_scalar_prefetch=0,
            grid=(n_pad // tn,),
            in_specs=[
                pl.BlockSpec((tn, 5), lambda i: (i, 0)),
                # Fused table: constant index_map -> resident in VMEM (~10 KB).
                pl.BlockSpec((FUSED_ROWS, OUT_DIM), lambda i: (0, 0)),
            ],
            out_specs=pl.BlockSpec((tn, OUT_DIM), lambda i: (i, 0)),
        ),
        compiler_params=pltpu.CompilerParams(
            dimension_semantics=("parallel",),
            vmem_limit_bytes=vmem_limit,
        ),
    )(x_flat, fused_table)

    return out[:n].reshape(*lead_shape, OUT_DIM)


def _reference(x, tables):
    x = x.astype(jnp.int32)
    pieces = [jnp.take(tables[k], x[..., k], axis=0) for k in range(5)]
    return jnp.concatenate(pieces, axis=-1)


if __name__ == "__main__":
    key = jax.random.PRNGKey(0)
    k_tabs = jax.random.split(key, 6)

    # Deterministic "parameters" (nn.Embedding weights), float32.
    tables = tuple(
        jax.random.normal(k_tabs[i], (VOCABS[i], DIMS[i]), dtype=jnp.float32)
        for i in range(5)
    )

    k_idx = jax.random.split(k_tabs[5], 10)

    # Case 1: batch=2, seq=8, 5 categorical codes per position
    # (exercises the >=2-step parallel grid path).
    batch, seq = 2, 8
    cols = [
        jax.random.randint(k_idx[i], (batch, seq), 0, VOCABS[i], dtype=jnp.int32)
        for i in range(5)
    ]
    x = jnp.stack(cols, axis=-1)  # (2, 8, 5) int32

    out = jax.block_until_ready(season_embedding(x, tables))
    ref = _reference(x, tables)
    assert out.shape == (batch, seq, OUT_DIM), out.shape
    assert jnp.allclose(out, ref, atol=1e-6, rtol=0.0), "mismatch vs reference (case 1)"

    # Case 2: odd leading shape (exercises the pad-and-slice path).
    cols2 = [
        jax.random.randint(k_idx[5 + i], (3, 7), 0, VOCABS[i], dtype=jnp.int32)
        for i in range(5)
    ]
    x2 = jnp.stack(cols2, axis=-1)  # (3, 7, 5) int32

    out2 = jax.block_until_ready(season_embedding(x2, tables))
    ref2 = _reference(x2, tables)
    assert out2.shape == (3, 7, OUT_DIM), out2.shape
    assert jnp.allclose(out2, ref2, atol=1e-6, rtol=0.0), "mismatch vs reference (case 2)"

    print("KERNEL_OK")
</pallas_src>

<mosaic_0001>
module attributes {stable_mosaic.version = 11 : i64} {
  func.func @_season_embed_kernel(%arg0: i32, %arg1: memref<8x5xi32, #tpu.memory_space<vmem>>, %arg2: memref<128x19xf32, #tpu.memory_space<vmem>>, %arg3: memref<8x19xf32, #tpu.memory_space<vmem>>) attributes {dimension_semantics = [#tpu.dimension_semantics<parallel>], iteration_bounds = array<i64: 2>, scalar_prefetch = 0 : i64, scratch_operands = 0 : i64, tpu.core_type = #tpu.core_type<tc>, window_params = [{transform_indices = @transform_0, window_bounds = array<i64: 8, 5>}, {pipeline_mode = #tpu.pipeline_mode<synchronous>, transform_indices = @transform_1, window_bounds = array<i64: 128, 19>}, {transform_indices = @transform_2, window_bounds = array<i64: 8, 19>}]} {
    %c0 = arith.constant 0 : index
    %c0_0 = arith.constant 0 : index
    %0 = vector.load %arg1[%c0, %c0_0] : memref<8x5xi32, #tpu.memory_space<vmem>>, vector<8x5xi32>
    %1 = tpu.iota {dimensions = array<i32: 1>} : vector<1x128xi32>
    %c26_i32 = arith.constant 26 : i32
    %2 = vector.broadcast %c26_i32 : i32 to vector<1x128xi32>
    %3 = arith.cmpi sge, %1, %2 : vector<1x128xi32>
    %4 = vector.extract_strided_slice %0 {offsets = [0, 1], sizes = [8, 1], strides = [1, 1]} : vector<8x5xi32> to vector<8x1xi32>
    %5 = vector.extract_strided_slice %0 {offsets = [0, 0], sizes = [8, 1], strides = [1, 1]} : vector<8x5xi32> to vector<8x1xi32>
    %6 = vector.shape_cast %3 : vector<1x128xi1> to vector<1x128xi1>
    %7 = vector.broadcast %6 : vector<1x128xi1> to vector<8x128xi1>
    %8 = vector.shape_cast %4 : vector<8x1xi32> to vector<8x1xi32>
    %9 = vector.broadcast %8 : vector<8x1xi32> to vector<8x128xi32>
    %10 = vector.shape_cast %5 : vector<8x1xi32> to vector<8x1xi32>
    %11 = vector.broadcast %10 : vector<8x1xi32> to vector<8x128xi32>
    %12 = arith.select %7, %9, %11 : vector<8x128xi1>, vector<8x128xi32>
    %c37_i32 = arith.constant 37 : i32
    %13 = vector.broadcast %c37_i32 : i32 to vector<1x128xi32>
    %14 = arith.cmpi sge, %1, %13 : vector<1x128xi32>
    %15 = vector.extract_strided_slice %0 {offsets = [0, 2], sizes = [8, 1], strides = [1, 1]} : vector<8x5xi32> to vector<8x1xi32>
    %16 = vector.shape_cast %14 : vector<1x128xi1> to vector<1x128xi1>
    %17 = vector.broadcast %16 : vector<1x128xi1> to vector<8x128xi1>
    %18 = vector.shape_cast %15 : vector<8x1xi32> to vector<8x1xi32>
    %19 = vector.broadcast %18 : vector<8x1xi32> to vector<8x128xi32>
    %20 = arith.select %17, %19, %12 : vector<8x128xi1>, vector<8x128xi32>
    %c55_i32 = arith.constant 55 : i32
    %21 = vector.broadcast %c55_i32 : i32 to vector<1x128xi32>
    %22 = arith.cmpi sge, %1, %21 : vector<1x128xi32>
    %23 = vector.extract_strided_slice %0 {offsets = [0, 3], sizes = [8, 1], strides = [1, 1]} : vector<8x5xi32> to vector<8x1xi32>
    %24 = vector.shape_cast %22 : vector<1x128xi1> to vector<1x128xi1>
    %25 = vector.broadcast %24 : vector<1x128xi1> to vector<8x128xi1>
    %26 = vector.shape_cast %23 : vector<8x1xi32> to vector<8x1xi32>
    %27 = vector.broadcast %26 : vector<8x1xi32> to vector<8x128xi32>
    %28 = arith.select %25, %27, %20 : vector<8x128xi1>, vector<8x128xi32>
    %c87_i32 = arith.constant 87 : i32
    %29 = vector.broadcast %c87_i32 : i32 to vector<1x128xi32>
    %30 = arith.cmpi sge, %1, %29 : vector<1x128xi32>
    %31 = vector.extract_strided_slice %0 {offsets = [0, 4], sizes = [8, 1], strides = [1, 1]} : vector<8x5xi32> to vector<8x1xi32>
    %32 = vector.shape_cast %30 : vector<1x128xi1> to vector<1x128xi1>
    %33 = vector.broadcast %32 : vector<1x128xi1> to vector<8x128xi1>
    %34 = vector.shape_cast %31 : vector<8x1xi32> to vector<8x1xi32>
    %35 = vector.broadcast %34 : vector<8x1xi32> to vector<8x128xi32>
    %36 = arith.select %33, %35, %28 : vector<8x128xi1>, vector<8x128xi32>
    %37 = vector.broadcast %1 : vector<1x128xi32> to vector<8x128xi32>
    %38 = arith.cmpi eq, %36, %37 : vector<8x128xi32>
    %39 = arith.extui %38 : vector<8x128xi1> to vector<8x128xi32>
    %40 = arith.sitofp %39 : vector<8x128xi32> to vector<8x128xf32>
    %c0_1 = arith.constant 0 : index
    %c0_2 = arith.constant 0 : index
    %41 = vector.load %arg2[%c0_1, %c0_2] : memref<128x19xf32, #tpu.memory_space<vmem>>, vector<128x19xf32>
    %cst = arith.constant dense<0.000000e+00> : vector<8x19xf32>
    %42 = tpu.matmul %40, %41, %cst {dimension_numbers = #tpu.dot_dimension_numbers<[1], [0], [0], [1], [0, 0, 1, 1], [], []>} : vector<8x128xf32>, vector<128x19xf32>, vector<8x19xf32> -> vector<8x19xf32>
    %c0_3 = arith.constant 0 : index
    %c0_4 = arith.constant 0 : index
    %43 = vector.load %arg3[%c0_3, %c0_4] : memref<8x19xf32, #tpu.memory_space<vmem>>, vector<8x19xf32>
    tpu.vector_store %arg3[%c0_3, %c0_4], %42 {strides = array<i32>} : memref<8x19xf32, #tpu.memory_space<vmem>>, vector<8x19xf32>,
    return
  }
  func.func @transform_0(%arg0: i32) -> (i32, i32) {
    %c0_i32 = arith.constant 0 : i32
    %c0_i32_0 = arith.constant 0 : i32
    return %arg0, %c0_i32 : i32, i32
  }
  func.func @transform_1(%arg0: i32) -> (i32, i32) {
    %c0_i32 = arith.constant 0 : i32
    %c0_i32_0 = arith.constant 0 : i32
    %c0_i32_1 = arith.constant 0 : i32
    return %c0_i32, %c0_i32_0 : i32, i32
  }
  func.func @transform_2(%arg0: i32) -> (i32, i32) {
    %c0_i32 = arith.constant 0 : i32
    %c0_i32_0 = arith.constant 0 : i32
    return %arg0, %c0_i32 : i32, i32
  }
}

</mosaic_0001>

<bundles_post_ra>
// kernel: tpu_custom_call.1
= control target key start
LH: loop header
LB: loop body
LE: loop exit
PB: predicated region body
PF: predicated region fallthrough
CT: control target
= control target key end

     0   :  { %7 = vsyncpa [#allocation3], 0  ;;  %s716_s0 = inlined_call_operand.vmem [shape: s32[16,5], index: 0, kind: input, shape index: {}]   ;;  %s717_s1 = inlined_call_operand.vmem [shape: f32[128,19], index: 1, kind: input, shape index: {}]   ;;  %s718_s2 = inlined_call_operand.hbm [shape: f32[16,19], index: 2, kind: output, shape index: {}]  }
   0x1   :  { %9 = vsyncpa [#allocation3 + $0x1], 0  ;;  %s568_s9 = smov 0   ;;  %s570_s10 = smov 0  }
   0x2   :  { %s572_s11 = smov 0   ;;  %s574_s12 = smov 0  }
   0x3 LB: > { %s589_s13 = sadd.s32 4294967295, %s541_s12   ;;  %s337_s14 = sadd.s32 4294967294, %s541_s12   ;;  %s541_s12 = sphi %s574_s12, %s724_s12   ;;  %s537_s11 = sphi %s572_s11, %s723_s11   ;;  %s533_s10 = sphi %s570_s10, %s722_s10   ;;  %s529_s9 = sphi %s568_s9, %s721_s9  }
   0x4   : > { %s593_s15 = sadd.s32 1, %s541_s12   ;;  %s69_s16 = sadd.s32 1, %s537_s11 }
   0x5   : > { %s66_s17 = ssub.s32 %s541_s12, %s593_s15  ;;  %p79_p0 = scmp.ne.s32.totalorder %s537_s11, %s533_s10 }
   0x6   : > { %p67_p1 = scmp.eq.s32.totalorder %s66_s17, 0  ;;  %p80_p2 = scmp.eq.s32.totalorder %s589_s13, 1 }
   0x7   : > { %p85_p3 = scmp.ne.s32.totalorder %s533_s10, %s529_s9  ;;  %p86_p4 = scmp.eq.s32.totalorder %s337_s14, 1 }
   0x8   : > { %s604_s18 = scalar_select %p67_p1, %s537_s11, %s69_s16  }
   0x9   : > { %p606_p5 = por %p80_p2, %p79_p0  ;;  %p610_p6 = por %p86_p4, %p85_p3 }
   0xa   : > { %p340_p7 = scmp.ge.s32.totalorder %s541_s12, 1  ;;  %p114_p8 = scmp.lt.s32.totalorder %s541_s12, 3 }
   0xc   : > { %p115_p9 = pnand %p340_p7, %p114_p8 }
   0xd   : > { %p135_p10 = scmp.lt.s32.totalorder (!%p115_p9), %s589_s13, 1  ;;  %v176_v0 = vld [vmem:[%s717_s1] sm:$0xff] (!%p115_p9)  ;;  %v543_v1 = vmov (!%p115_p9), 2   ;;  %v544_v2 = vmov (!%p115_p9), 1   ;;  %v177_v3 = vld [vmem:[%s717_s1 + $0x8] sm:$0xff] (!%p115_p9)  ;;  %v178_v4 = vld [vmem:[%s717_s1 + $0x10] sm:$0xff] (!%p115_p9)  ;;  %v140_v32 = vlaneseq (!%p115_p9) }
   0xe   : > { %118 = sbr.rel (%p115_p9) target bundleno = 392 (0x188), region = 28  ;;  %475 = vset.pattern.permute.xlu1 (!%p115_p9), %v543_v1  ;;  %473 = vset.pattern.permute.xlu0 (!%p115_p9), %v544_v2  ;;  %v179_v5 = vld [vmem:[%s717_s1 + $0x18] sm:$0xff] (!%p115_p9)  ;;  %v545_v6 = vmov (!%p115_p9), 0.0|0.0   ;;  %v402_v7 = vpack.c.bf16 (!%p115_p9), %v177_v3, %v176_v0  ;;  %v180_v10 = vld [vmem:[%s717_s1 + $0x20] sm:$0xff] (!%p115_p9)  ;;  %v181_v11 = vld [vmem:[%s717_s1 + $0x28] sm:$0xff] (!%p115_p9)  ;;  %v546_v15 = vmov (!%p115_p9), 3  }
   0xf   : > { %401 = vmatprep.subr.bf16.mxu0 (!%p115_p9), %v545_v6  ;;  %v405_v8 = vpack.c.bf16 (!%p115_p9), %v179_v5, %v178_v4  ;;  %v408_v12 = vpack.c.bf16 (!%p115_p9), %v181_v11, %v180_v10  ;;  %v182_v13 = vld [vmem:[%s717_s1 + $0x30] sm:$0xff] (!%p115_p9)  ;;  %v183_v14 = vld [vmem:[%s717_s1 + $0x38] sm:$0xff] (!%p115_p9)  ;;  %v547_v16 = vmov (!%p115_p9), 0   ;;  %v184_v18 = vld [vmem:[%s717_s1 + $0x40] sm:$0xff] (!%p115_p9)  ;;  %v548_v20 = vmov (!%p115_p9), 4   ;;  %s132_s17 = sand.u32 (!%p115_p9), 1, %s533_s10  }
  0x10   : > { %403 = vmatpush3.bf16.msra.mxu0 (!%p115_p9), %v402_v7  ;;  %v411_v17 = vpack.c.bf16 (!%p115_p9), %v183_v14, %v182_v13  ;;  %v185_v19 = vld [vmem:[%s717_s1 + $0x48] sm:$0xff] (!%p115_p9)  ;;  %v186_v22 = vld [vmem:[%s717_s1 + $0x50] sm:$0xff] (!%p115_p9)  ;;  %v187_v23 = vld [vmem:[%s717_s1 + $0x58] sm:$0xff] (!%p115_p9)  ;;  %vm549_vm0 = vmmov (!%p115_p9), 0   ;;  %v550_v24 = vmov (!%p115_p9), 0.0   ;;  %v141_v33 = vand.u32 (!%p115_p9), 127, %v140_v32 }
  0x11   : > { %404 = vmatprep.subr.bf16.mxu0 (!%p115_p9), %v545_v6  ;;  %v414_v21 = vpack.c.bf16 (!%p115_p9), %v185_v19, %v184_v18  ;;  %398 = vmatprep.mubr.msk.f32.mxu0 (!%p115_p9), %vm549_vm0, %v550_v24  ;;  %v417_v25 = vpack.c.bf16 (!%p115_p9), %v187_v23, %v186_v22  ;;  %v188_v26 = vld [vmem:[%s717_s1 + $0x60] sm:$0xff] (!%p115_p9)  ;;  %v189_v27 = vld [vmem:[%s717_s1 + $0x68] sm:$0xff] (!%p115_p9)  ;;  %v190_v29 = vld [vmem:[%s717_s1 + $0x70] sm:$0xff] (!%p115_p9)  ;;  %v551_v43 = vmov (!%p115_p9), 1.0   ;;  %s341_s21 = sshll.u32 (!%p115_p9), %s132_s17, 3  ;;  %s346_s22 = sshll.u32 (!%p115_p9), %s589_s13, 7 }
  0x12   : > { %v420_v28 = vpack.c.bf16 (!%p115_p9), %v189_v27, %v188_v26  ;;  %v191_v30 = vld [vmem:[%s717_s1 + $0x78] sm:$0xff] (!%p115_p9)  ;;  %vm142_vm1 = vcmp.ge.s32.totalorder (!%p115_p9), %v141_v33, 26  ;;  %vm152_vm2 = vcmp.ge.s32.totalorder (!%p115_p9), %v141_v33, 37  ;;  %vm159_vm3 = vcmp.ge.s32.totalorder (!%p115_p9), %v141_v33, 55  ;;  %s134_s23 = scalar_lea.vmem (!%p115_p9), [#allocation2], %s341_s21  ;;  %s674_s27 = scalar_lea.hbm (!%p115_p9), %s718_s2, %s346_s22 }
  0x13   : > { %v423_v31 = vpack.c.bf16 (!%p115_p9), %v191_v30, %v190_v29  ;;  %vm166_vm4 = vcmp.ge.s32.totalorder (!%p115_p9), %v141_v33, 87  ;;  %s278_s24 = sshll.u32 (!%p115_p9), %s134_s23, 4  ;;  %vm262_vm6 = vcmask (!%p115_p9), 154624   ;;  %s265_s28 = scalar_lea.sflag (!%p115_p9), [#allocation3], %s132_s17  ;;  %s676_s24 = int_to_ptr.vmem [resolvable:$true] %s278_s24 }
  0x14   : > { %406 = vmatpush3.bf16.msra.mxu0 (!%p115_p9), %v405_v8 }
  0x15   : > { %s136_s29 = scalar_select %p135_p10, %s589_s13, 1  ;;  %407 = vmatprep.subr.bf16.mxu0 %v545_v6 }
  0x16   : > { %s552_s13 = smov [#allocation2]  }
  0x17   : > { %s342_s30 = sshll.u32 %s136_s29, 3  ;;  %s479_s29 = scalar_lea.vmem %s676_s24, 128 }
  0x18   : > { %s138_s5 = scalar_lea.vmem %s716_s0, %s342_s30  ;;  %409 = vmatpush3.bf16.msra.mxu0 %v408_v12  ;;  %p480_p11 = scmp.ne.s32.totalorder %s676_s24, %s479_s29 }
  0x19   : > { %v139_v9 = vld [vmem:[%s138_s5] sm:$0xff]  ;;  %410 = vmatprep.subr.bf16.mxu0 %v545_v6  ;;  %s483_s30 = sshll.u32 %s552_s13, 4  ;;  %s484_s30 = int_to_ptr.vmem [resolvable:$false] %s483_s30 }
  0x1a   : > { %156 = vperm.xlu1 %475, %v139_v9   ;;  %146 = vperm.xlu0 %473, %v139_v9   ;;  %p481_p12 = pnand %p480_p11, %p606_p5  ;;  %s485_s3 = scalar_lea.vmem %s484_s30, 256 }
  0x1b   : > { %p486_p0 = scmp.lt.s32.totalorder %s676_s24, %s484_s30  ;;  %p487_p1 = scmp.lt.s32.totalorder %s485_s3, %s479_s29 }
  0x1c   : > { %412 = vmatpush3.bf16.msra.mxu0 %v411_v17  ;;  %p482_p13 = pneg %p481_p12 }
  0x1d   : > { %413 = vmatprep.subr.bf16.mxu0 %v545_v6  ;;  %p488_p2 = por %p487_p1, %p486_p0 }
  0x1e   : > { %476 = vset.pattern.permute.xlu1 %v546_v15  ;;  %474 = vset.pattern.permute.xlu0 %v547_v16 }
  0x1f   : > { %163 = vperm.xlu1 %476, %v139_v9   ;;  %149 = vperm.xlu0 %474, %v139_v9   ;;  %p489_p3 = pnand %p488_p2, %p482_p13 }
  0x20   : > { %415 = vmatpush3.bf16.msra.mxu0 %v414_v21 }
  0x21   : > { %416 = vmatprep.subr.bf16.mxu0 %v545_v6 }
  0x23   : > { %477 = vset.pattern.permute.xlu1 %v548_v20  ;;  %478 = vset.pattern.permute.xlu0 %v548_v20 }
  0x24   : > { %170 = vperm.xlu1 %477, %v139_v9   ;;  %418 = vmatpush3.bf16.msra.mxu0 %v417_v25 }
  0x25   : > { %419 = vmatprep.subr.bf16.mxu0 %v545_v6 }
  0x28   : > { %421 = vmatpush3.bf16.msra.mxu0 %v420_v28 }
  0x29   : > { %422 = vmatprep.subr.bf16.mxu0 %v545_v6 }
  0x2c   : > { %424 = vmatpush3.bf16.msra.mxu0 %v423_v31 }
  0x99   : > { %v157_v34 = vpop.permute.xlu1 %156  ;;  %v147_v35 = vpop.permute.xlu0 %146 }
  0x9e   : > { %v164_v36 = vpop.permute.xlu1 %163  ;;  %v150_v37 = vpop.permute.xlu0 %149 }
  0x9f   : > { %v151_v38 = vsel %vm142_vm1, %v147_v35, %v150_v37 }
  0xa0   : > { %v158_v39 = vsel %vm152_vm2, %v157_v34, %v151_v38 }
  0xa1   : > { %v165_v41 = vsel %vm159_vm3, %v164_v36, %v158_v39 }
  0xa3   : > { %v171_v40 = vpop.permute.xlu1 %170 }
  0xa4   : > { %v172_v42 = vsel %vm166_vm4, %v171_v40, %v165_v41 }
  0xa5   : > { %vm173_vm5 = vcmp.eq.s32.totalorder %v172_v42, %v141_v33 }
  0xa6   : > { %399 = vmatmul.mubr.msk.f32.vlgmr.msra.gmra.mrb[0].mxu0 %vm173_vm5, %v551_v43 }
 0x179   : > { %v258_v44 = vpop.f32.mrb[0].mxu0 }
 0x17a   : > { %263 = vst.msk [vmem:[%s134_s23] sm:$0xff] %vm262_vm6, %v258_v44  ;;  %v400_v45 = vpop.f32.mrb[1].mxu0 }
 0x17b   : > { %492 = shalt.err (!%p489_p3)
}
 0x17c   : > { %s493_s4 = scalar_lea.hbm %s674_s27, 128  ;;  %s497_s7 = scalar_lea.hbm %s718_s2, 256 }
 0x17d   : > { %p494_p4 = scmp.ne.s32.totalorder %s674_s27, %s493_s4  ;;  %p498_p9 = scmp.lt.u32.totalorder %s674_s27, %s718_s2 }
 0x17e   : > { %p499_p10 = scmp.lt.u32.totalorder %s497_s7, %s493_s4  ;;  %p501_p12 = scmp.lt.u32.totalorder %s493_s4, %s674_s27 }
 0x17f   : > { %p495_p7 = pnand %p494_p4, %p606_p5 }
 0x180   : > { %p500_p11 = por %p499_p10, %p498_p9 }
 0x181   : > { %p496_p8 = pneg %p495_p7 }
 0x182   : > { %p502_p13 = por %p501_p12, %p500_p11 }
 0x184   : > { %p503_p0 = pnand %p502_p13, %p496_p8 }
 0x186   : > { %506 = shalt.err (!%p503_p0)
}
 0x187   : > { %425 = dma.vmem_to_hbm [thread:$0]  (%p606_p5), %s676_s24, 128, %s674_s27, %s265_s28  }
 0x188 PF: > { %p431_p1 = scmp.ge.s32.totalorder %s541_s12, 2  ;;  %s290_s16 = sand.u32 1, %s529_s9  }
 0x189   : > { %s291_s17 = scalar_lea.sflag [#allocation3], %s290_s16 }
 0x18a   : > { %p428_p2 = pnand %p431_p1, %p610_p6 }
 0x18c   : > { %524 = dma.done.wait (!%p428_p2), %s291_s17, 128  }
 0x18d   : > { %526 = vsyncadd (!%p428_p2), %s291_s17, 4294967168  ;;  %p12_p3 = scmp.ge.s32.totalorder %s593_s15, 4   ;;  %s721_s9 = smov %s533_s10 }
 0x18e   : > { %s722_s10 = smov %s537_s11  ;;  %s723_s11 = smov %s604_s18 }
 0x18f   : > { %s724_s12 = smov %s593_s15  ;;  %14 = sbr.rel (!%p12_p3) target bundleno = 3 (0x3), region = 63 }
 0x196   :  { %296 = vsyncpa [#allocation3], 1 }
 0x197   :  { %298 = vsyncpa [#allocation3 + $0x1], 1 }

</bundles_post_ra>
